<compile_context>
chip_gen: v6e
topology: v6e:2x2x1
jax: 0.10.0
libtpu: 0.0.40
codegen_flags: <defaults>
</compile_context>

<pallas_src>
import functools

import jax
import jax.numpy as jnp
from jax.experimental import pallas as pl
from jax.experimental.pallas import tpu as pltpu


def _sparse_rmsnorm_kernel(x_ref, wm_ref, o_ref, *, eps):
    # x_ref: (tm, H) input dtype
    # wm_ref: (2, H) f32 resident; row 0 = weight (f32), row 1 = mask / n_masked
    x32 = x_ref[...].astype(jnp.float32)
    wm = wm_ref[...]
    w = wm[0:1, :]                                      # (1, H) f32 weight
    ms = wm[1:2, :]                                     # (1, H) f32 scaled mask

    # Masked mean of x^2 as a single weighted row-sum (1/n folded into ms).
    variance = jnp.sum((x32 * ms) * x32, axis=-1, keepdims=True)   # (tm, 1)
    y = x32 * jax.lax.rsqrt(variance + eps)                        # (tm, H)

    # Match torch's `weight * y.to(input_dtype)` promotion (no-op for f32 input).
    y_in = y.astype(x_ref.dtype).astype(jnp.float32)
    o_ref[...] = (w * y_in).astype(o_ref.dtype)


def _choose_tm(n_rows, h, itemsize, sublane, tile_budget_bytes):
    # Per row of tile: double-buffered input + double-buffered output
    # (in/out dtype) plus ~4 live f32 (tm, H) temporaries in the body
    # (x32, masked product, y, y_in / weighted result).
    per_row = h * (2 * itemsize + 2 * itemsize + 4 * 4)
    tm = (tile_budget_bytes // per_row) // sublane * sublane
    tm = int(max(sublane, min(tm, 1024)))
    # Keep >= 2 grid steps when N allows: enough for double-buffer overlap and
    # for both v7x TensorCores; more steps only adds per-step overhead on
    # single-TC v5e/v6e.
    if n_rows > sublane:
        half = pl.cdiv(pl.cdiv(n_rows, 2), sublane) * sublane
        tm = min(tm, max(sublane, int(half)))
    return tm


def sparse_rmsnorm(hidden_states, weight, mask, eps, *, tm=None,
                   tile_budget_bytes=12 * 1024 * 1024):
    """hidden_states: (B, S, H); weight: (H,); mask: (H,) {0,1}; eps: float.

    Precondition: mask has at least one active channel (torch would produce
    Inf/NaN for an all-zero mask; the wrapper clamps the count to 1 instead).
    """
    B, S, H = hidden_states.shape
    N = B * S
    dtype = hidden_states.dtype
    itemsize = jnp.dtype(dtype).itemsize

    # Sublane packing: f32 -> 8 rows/vreg, bf16 -> 16, int8/fp8 -> 32.
    sublane = max(8, 32 // max(itemsize, 1))

    if tm is None:
        tm = _choose_tm(N, H, itemsize, sublane, tile_budget_bytes)
    else:
        tm = int(max(sublane, pl.cdiv(int(tm), sublane) * sublane))

    # --- wrapper-side prep (runs once, not per tile) ---
    x2d = hidden_states.reshape(N, H)

    mask_f = (mask == 1).astype(jnp.float32).reshape(1, H)
    n_masked = jnp.sum(mask_f)
    inv_n = 1.0 / jnp.maximum(n_masked, 1.0)     # guard against all-zero mask
    ms2d = mask_f * inv_n                        # mask / num_masked, f32
    w2d = weight.astype(jnp.float32).reshape(1, H)
    wm = jnp.concatenate([w2d, ms2d], axis=0)    # (2, H) f32 resident input

    kernel = functools.partial(_sparse_rmsnorm_kernel, eps=float(eps))

    grid = (pl.cdiv(N, tm),)

    cost = pl.CostEstimate(
        flops=5 * N * H,
        transcendentals=N,                                 # one rsqrt per row
        bytes_accessed=2 * N * H * itemsize + 2 * H * 4,   # x in + out + (2,H) f32
    )

    out2d = pl.pallas_call(
        kernel,
        out_shape=jax.ShapeDtypeStruct((N, H), dtype),
        grid_spec=pltpu.PrefetchScalarGridSpec(
            num_scalar_prefetch=0,
            grid=grid,
            in_specs=[
                pl.BlockSpec((tm, H), lambda i: (i, 0)),
                pl.BlockSpec((2, H), lambda i: (0, 0)),    # weight+mask (resident)
            ],
            out_specs=pl.BlockSpec((tm, H), lambda i: (i, 0)),
        ),
        compiler_params=pltpu.CompilerParams(
            dimension_semantics=("parallel",),
            vmem_limit_bytes=48 * 1024 * 1024,
        ),
        cost_estimate=cost,
    )(x2d, wm)

    return out2d.reshape(B, S, H)


def _reference(hidden_states, weight, mask, eps):
    x32 = hidden_states.astype(jnp.float32)
    sel = (mask == 1)
    n = jnp.sum(sel.astype(jnp.float32))
    var = jnp.sum(jnp.where(sel[None, None, :], x32 * x32, 0.0),
                  axis=-1, keepdims=True) / n
    y = x32 * jax.lax.rsqrt(var + eps)
    return (weight.astype(jnp.float32) *
            y.astype(hidden_states.dtype).astype(jnp.float32)).astype(hidden_states.dtype)


if __name__ == "__main__":
    key = jax.random.PRNGKey(0)
    kx, kw, km, kx2 = jax.random.split(key, 4)

    eps = 1e-6
    B, S, H = 2, 8, 32

    x = jax.random.normal(kx, (B, S, H), dtype=jnp.float32)
    weight = 1.0 + 0.1 * jax.random.normal(kw, (H,), dtype=jnp.float32)
    mask = (jax.random.uniform(km, (H,)) > 0.5).astype(jnp.float32)
    mask = mask.at[0].set(1.0)   # at least one active channel

    out = sparse_rmsnorm(x, weight, mask, eps)
    out = jax.block_until_ready(out)
    ref = _reference(x, weight, mask, eps)
    assert out.shape == (B, S, H)
    assert jnp.allclose(out, ref, atol=1e-5, rtol=1e-5)

    # Second shape: row count not a multiple of the tile (exercises the
    # partial-edge-block path with no wrapper-side padding).
    B2, S2 = 2, 5
    x2 = jax.random.normal(kx2, (B2, S2, H), dtype=jnp.float32)
    out2 = jax.block_until_ready(sparse_rmsnorm(x2, weight, mask, eps))
    ref2 = _reference(x2, weight, mask, eps)
    assert out2.shape == (B2, S2, H)
    assert jnp.allclose(out2, ref2, atol=1e-5, rtol=1e-5)

    print("KERNEL_OK")
</pallas_src>

<mosaic_0001>
module attributes {stable_mosaic.version = 11 : i64} {
  func.func @_sparse_rmsnorm_kernel(%arg0: i32, %arg1: memref<8x32xf32, #tpu.memory_space<vmem>>, %arg2: memref<2x32xf32, #tpu.memory_space<vmem>>, %arg3: memref<8x32xf32, #tpu.memory_space<vmem>>) attributes {dimension_semantics = [#tpu.dimension_semantics<parallel>], iteration_bounds = array<i64: 2>, scalar_prefetch = 0 : i64, scratch_operands = 0 : i64, tpu.core_type = #tpu.core_type<tc>, window_params = [{transform_indices = @transform_0, window_bounds = array<i64: 8, 32>}, {pipeline_mode = #tpu.pipeline_mode<synchronous>, transform_indices = @transform_1, window_bounds = array<i64: 2, 32>}, {transform_indices = @transform_2, window_bounds = array<i64: 8, 32>}]} {
    %c0 = arith.constant 0 : index
    %c0_0 = arith.constant 0 : index
    %0 = vector.load %arg1[%c0, %c0_0] : memref<8x32xf32, #tpu.memory_space<vmem>>, vector<8x32xf32>
    %c0_1 = arith.constant 0 : index
    %c0_2 = arith.constant 0 : index
    %1 = vector.load %arg2[%c0_1, %c0_2] : memref<2x32xf32, #tpu.memory_space<vmem>>, vector<2x32xf32>
    %2 = vector.extract_strided_slice %1 {offsets = [0, 0], sizes = [1, 32], strides = [1, 1]} : vector<2x32xf32> to vector<1x32xf32>
    %3 = vector.extract_strided_slice %1 {offsets = [1, 0], sizes = [1, 32], strides = [1, 1]} : vector<2x32xf32> to vector<1x32xf32>
    %4 = vector.broadcast %3 : vector<1x32xf32> to vector<8x32xf32>
    %5 = arith.mulf %0, %4 : vector<8x32xf32>
    %6 = arith.mulf %5, %0 : vector<8x32xf32>
    %cst = arith.constant dense<0.000000e+00> : vector<8xf32>
    %7 = vector.multi_reduction <add>, %6, %cst [1] : vector<8x32xf32> to vector<8xf32>
    %8 = vector.shape_cast %7 : vector<8xf32> to vector<8x1xf32>
    %cst_3 = arith.constant 9.99999997E-7 : f32
    %9 = vector.broadcast %cst_3 : f32 to vector<8x1xf32>
    %10 = arith.addf %8, %9 : vector<8x1xf32>
    %11 = math.rsqrt %10 : vector<8x1xf32>
    %12 = vector.broadcast %11 : vector<8x1xf32> to vector<8x32xf32>
    %13 = arith.mulf %0, %12 : vector<8x32xf32>
    %14 = vector.broadcast %2 : vector<1x32xf32> to vector<8x32xf32>
    %15 = arith.mulf %14, %13 : vector<8x32xf32>
    %c0_4 = arith.constant 0 : index
    %c0_5 = arith.constant 0 : index
    %16 = vector.load %arg3[%c0_4, %c0_5] : memref<8x32xf32, #tpu.memory_space<vmem>>, vector<8x32xf32>
    tpu.vector_store %arg3[%c0_4, %c0_5], %15 {strides = array<i32>} : memref<8x32xf32, #tpu.memory_space<vmem>>, vector<8x32xf32>,
    return
  }
  func.func @transform_0(%arg0: i32) -> (i32, i32) {
    %c0_i32 = arith.constant 0 : i32
    %c0_i32_0 = arith.constant 0 : i32
    return %arg0, %c0_i32 : i32, i32
  }
  func.func @transform_1(%arg0: i32) -> (i32, i32) {
    %c0_i32 = arith.constant 0 : i32
    %c0_i32_0 = arith.constant 0 : i32
    %c0_i32_1 = arith.constant 0 : i32
    return %c0_i32, %c0_i32_0 : i32, i32
  }
  func.func @transform_2(%arg0: i32) -> (i32, i32) {
    %c0_i32 = arith.constant 0 : i32
    %c0_i32_0 = arith.constant 0 : i32
    return %arg0, %c0_i32 : i32, i32
  }
}

</mosaic_0001>

<bundles_post_ra>
// kernel: tpu_custom_call.1
= control target key start
LH: loop header
LB: loop body
LE: loop exit
PB: predicated region body
PF: predicated region fallthrough
CT: control target
= control target key end

     0   :  { %7 = vsyncpa [#allocation3], 0  ;;  %s668_s0 = inlined_call_operand.hbm [shape: f32[16,32], index: 0, kind: input, shape index: {}]   ;;  %s669_s1 = inlined_call_operand.hbm [shape: f32[2,32], index: 1, kind: input, shape index: {}]   ;;  %s670_s2 = inlined_call_operand.hbm [shape: f32[16,32], index: 2, kind: output, shape index: {}]  }
   0x1   :  { %9 = vsyncpa [#allocation3 + $0x1], 0 }
   0x2   :  { %10 = vsyncpa [#allocation6], 0 }
   0x3   :  { %11 = vsyncpa [#allocation4], 0 }
   0x4   :  { %13 = vsyncpa [#allocation4 + $0x1], 0  ;;  %s502_s9 = smov 0   ;;  %s504_s10 = smov 0  }
   0x5   :  { %s506_s11 = smov 0   ;;  %s508_s12 = smov 0  }
   0x6 LB: > { %s523_s13 = sadd.s32 4294967295, %s482_s12   ;;  %s287_s14 = sadd.s32 4294967294, %s482_s12   ;;  %s482_s12 = sphi %s508_s12, %s693_s12   ;;  %s478_s11 = sphi %s506_s11, %s692_s11   ;;  %s474_s10 = sphi %s504_s10, %s691_s10   ;;  %s470_s9 = sphi %s502_s9, %s690_s9  }
   0x7   : > { %p39_p0 = scmp.ne.s32.totalorder %s474_s10, %s470_s9  ;;  %p671_p1 = scmp.eq.s32.totalorder %s523_s13, 0 }
   0x8   : > { %p90_p3 = scmp.eq.s32.totalorder %s287_s14, 1  ;;  %p288_p5 = scmp.ge.s32.totalorder %s482_s12, 1 }
   0x9   : > { %p532_p4 = por %p671_p1, %p39_p0  ;;  %p97_p7 = scmp.lt.s32.totalorder %s482_s12, 3 }
   0xa   : > { %p537_p6 = por %p90_p3, %p39_p0  ;;  %s484_s18 = smov [#allocation5]  }
   0xb   : > { %s675_s15 = scalar_select %p532_p4, 1, 0 }
   0xc   : > { %s676_s16 = scalar_select %p537_p6, 1, 0 }
   0xd   : > { %p542_p8 = pnand %p288_p5, %p97_p7  ;;  %s110_s19 = sshll.u32 %s484_s18, 4  ;;  %s111_s19 = int_to_ptr.vmem [resolvable:$true] %s110_s19 }
   0xe   : > { %s550_s20 = sadd.s32 1, %s482_s12   ;;  %s26_s24 = sadd.s32 1, %s478_s11 }
   0xf   : > { %s677_s17 = scalar_select %p542_p8, 1, 0 }
  0x10   : > { %p309_p10 = pneg %p542_p8  ;;  %s23_s22 = ssub.s32 %s482_s12, %s550_s20 }
  0x11   : > { %p560_p12 = scmp.eq.s32.totalorder %s23_s22, 0  ;;  %p33_p13 = scmp.ne.s32.totalorder %s478_s11, %s474_s10 }
  0x12   : > { %p554_p11 = pnand %p309_p10, %p671_p1  ;;  %s371_s25 = scalar_lea.vmem %s111_s19, 32 }
  0x13   : > { %p372_p3 = scmp.ne.s32.totalorder %s111_s19, %s371_s25  ;;  %p379_p9 = scmp.lt.s32.totalorder %s111_s19, %s111_s19 }
  0x14   : > { %p362_p0 = pneg %p554_p11  ;;  %p380_p2 = scmp.lt.s32.totalorder %s371_s25, %s371_s25 }
  0x16   : > { %p374_p5 = pnand %p372_p3, %p362_p0  ;;  %p381_p10 = por %p380_p2, %p379_p9 }
  0x18   : > { %p375_p7 = pneg %p374_p5 }
  0x1a   : > { %p382_p1 = pnand %p381_p10, %p375_p7 }
  0x1c   : > { %385 = shalt.err (!%p382_p1)
}
  0x1d   : > { %312 = dma.hbm_to_vmem [thread:$0]  (!%p554_p11), %s669_s1, 32, %s111_s19, [#allocation6]  }
  0x1e   : > { %s577_s28 = scalar_select %p560_p12, %s478_s11, %s26_s24  }
  0x1f   : > { %p34_p1 = scmp.eq.s32.totalorder %s482_s12, 0  ;;  %p680_p2 = scmp.eq.s32.totalorder %s523_s13, 1 }
  0x20   : > { %p322_p0 = scmp.lt.s32.totalorder %s482_s12, 2  ;;  %s121_s30 = sand.u32 1, %s478_s11  }
  0x21   : > { %p585_p9 = por %p680_p2, %p33_p13  ;;  %p35_p3 = por %p34_p1, %p33_p13 }
  0x22   : > { %s291_s3 = sshll.u32 %s121_s30, 3  ;;  %s292_s4 = sshll.u32 %s482_s12, 7 }
  0x23   : > { %s681_s29 = scalar_select %p585_p9, 1, 0 }
  0x24   : > { %s598_s7 = scalar_lea.hbm %s668_s0, %s292_s4  ;;  %s125_s8 = scalar_lea.vmem [#allocation2], %s291_s3 }
  0x25   : > { %s132_s14 = sshll.u32 %s125_s8, 4  ;;  %p600_p11 = pnand %p322_p0, %p35_p3  ;;  %s133_s14 = int_to_ptr.vmem [resolvable:$true] %s132_s14 }
  0x26   : > { %s122_s19 = scalar_lea.sflag [#allocation3], %s121_s30  ;;  %s386_s21 = scalar_lea.hbm %s598_s7, 128 }
  0x27   : > { %p387_p12 = scmp.ne.s32.totalorder %s598_s7, %s386_s21  ;;  %p388_p13 = pneg %p600_p11 }
  0x28   : > { %s391_s24 = scalar_lea.hbm %s668_s0, 256  ;;  %p392_p10 = scmp.lt.s32.totalorder %s598_s7, %s668_s0 }
  0x29   : > { %p389_p5 = pnand %p388_p13, %p387_p12  ;;  %p393_p1 = scmp.lt.s32.totalorder %s391_s24, %s386_s21 }
  0x2b   : > { %p390_p7 = pneg %p389_p5  ;;  %p394_p2 = por %p393_p1, %p392_p10 }
  0x2d   : > { %p395_p0 = pnand %p394_p2, %p390_p7 }
  0x2f   : > { %398 = shalt.err (!%p395_p0)
}
  0x30   : > { %s399_s27 = scalar_lea.vmem %s133_s14, 128  ;;  %s485_s30 = smov [#allocation2]  }
  0x31   : > { %p400_p3 = scmp.ne.s32.totalorder %s133_s14, %s399_s27  ;;  %s404_s3 = sshll.u32 %s485_s30, 4  ;;  %s405_s3 = int_to_ptr.vmem [resolvable:$false] %s404_s3 }
  0x32   : > { %s406_s4 = scalar_lea.vmem %s405_s3, 256  ;;  %p407_p12 = scmp.lt.s32.totalorder %s133_s14, %s405_s3 }
  0x33   : > { %p402_p6 = pnand %p400_p3, %p388_p13  ;;  %p408_p5 = scmp.lt.s32.totalorder %s406_s4, %s399_s27 }
  0x35   : > { %p403_p9 = pneg %p402_p6  ;;  %p409_p4 = por %p408_p5, %p407_p12 }
  0x37   : > { %p410_p8 = pnand %p409_p4, %p403_p9 }
  0x39   : > { %413 = shalt.err (!%p410_p8)
}
  0x3a   : > { %316 = dma.hbm_to_vmem [thread:$0]  (!%p600_p11), %s598_s7, 128, %s133_s14, %s122_s19  }
  0x3b   : > { %p683_p7 = scmp.ne.s32.totalorder %s677_s17, 0 }
  0x3c   : > { %s621_s5 = sand.u32 (!%p683_p7), 1, %s474_s10   ;;  %p684_p6 = scmp.ne.s32.totalorder (!%p683_p7), %s675_s15, 0 }
  0x3d   : > { %141 = sbr.rel (%p683_p7) target bundleno = 254 (0xfe), region = 28  ;;  %s294_s6 = sshll.u32 (!%p683_p7), %s621_s5, 3 }
  0x3e   : > { %s144_s8 = scalar_lea.sflag (!%p683_p7), [#allocation3], %s621_s5  ;;  %s147_s21 = scalar_lea.vmem (!%p683_p7), [#allocation2], %s294_s6 }
  0x42   : > { %457 = dma.done.wait (%p684_p6), %s144_s8, 128  }
  0x43   : > { %459 = vsyncadd (%p684_p6), %s144_s8, 4294967168  ;;  %p685_p4 = scmp.eq.s32.totalorder %s523_s13, 0 }
  0x45   : > { %461 = dma.done.wait (%p685_p4), [#allocation6], 32   ;;  %p686_p8 = pmov %p685_p4 }
  0x46   : > { %v174_v0 = vlaneseq  ;;  %v172_v4 = vld [vmem:[%s147_s21] sm:$0xff]  ;;  %v173_v5 = vld [vmem:[#allocation5] sm:$0x3]  ;;  %vm180_vm0 = vcmask 261120   ;;  %s298_s15 = sshll.u32 %s523_s13, 7  ;;  %s171_s17 = scalar_lea.vmem [#allocation7], %s294_s6 }
  0x47   : > { %463 = vsyncadd (%p686_p8), [#allocation6], 4294967264  ;;  %s207_s7 = sshll.u32 %s171_s17, 4  ;;  %s205_s19 = scalar_lea.hbm %s670_s2, %s298_s15  ;;  %s208_s7 = int_to_ptr.vmem [resolvable:$true] %s207_s7 }
  0x48   : > { %v175_v1 = vshrl.u32 %v174_v0, 7  ;;  %s194_s22 = scalar_lea.sflag [#allocation4], %s621_s5  ;;  %s414_s23 = scalar_lea.vmem %s208_s7, 128 }
  0x49   : > { %p415_p9 = scmp.ne.s32.totalorder %s208_s7, %s414_s23  ;;  %p687_p11 = scmp.ne.s32.totalorder %s681_s29, 0 }
  0x4a   : > { %v176_v2 = vsub.s32 1, %v175_v1  ;;  %v189_v3 = vsub.s32 0, %v175_v1  ;;  %s486_s24 = smov [#allocation7]  }
  0x4b   : > { %p416_p13 = pnand %p415_p9, %p687_p11  ;;  %s418_s25 = sshll.u32 %s486_s24, 4  ;;  %s419_s25 = int_to_ptr.vmem [resolvable:$false] %s418_s25 }
  0x4c   : > { %v177_v6 = vrot.slane %v173_v5, %v176_v2  ;;  %v190_v7 = vrot.slane %v173_v5, %v189_v3  ;;  %s420_s13 = scalar_lea.vmem %s419_s25, 256  ;;  %p421_p1 = scmp.lt.s32.totalorder %s208_s7, %s419_s25 }
  0x4d   : > { %p417_p10 = pneg %p416_p13  ;;  %p422_p2 = scmp.lt.s32.totalorder %s420_s13, %s414_s23 }
  0x4e   : > { %v178_v8 = vmul.f32 %v177_v6, %v172_v4 }
  0x4f   : > { %p423_p0 = por %p422_p2, %p421_p1 }
  0x50   : > { %v179_v9 = vmul.f32 %v178_v8, %v172_v4 }
  0x51   : > { %p424_p3 = pnand %p423_p0, %p417_p10 }
  0x52   : > { %v181_v10 = vsel %vm180_vm0, %v179_v9, 0.0 }
  0x53   : > { %182 = vadd.xlane.f32.xlu0 %v181_v10 }
  0xdc   : > { %v183_v11 = vpop.xlane.xlu0 %182 }
  0xdd   : > { %v184_v12 = vadd.f32 1e-06, %v183_v11 }
  0xdf   : > { %358 = vrsqrt.f32 %v184_v12 }
  0xec   : > { %v359_v13 = vpop.eup %358 }
  0xed   : > { %v186_v14 = vmul.f32 %v359_v13, %v172_v4 }
  0xef   : > { %v191_v15 = vmul.f32 %v190_v7, %v186_v14 }
  0xf1   : > { %192 = vst.msk [vmem:[%s171_s17] sm:$0xff] %vm180_vm0, %v191_v15 }
  0xf2   : > { %427 = shalt.err (!%p424_p3)
}
  0xf3   : > { %s428_s26 = scalar_lea.hbm %s205_s19, 128  ;;  %s432_s3 = scalar_lea.hbm %s670_s2, 256 }
  0xf4   : > { %p429_p12 = scmp.ne.s32.totalorder %s205_s19, %s428_s26  ;;  %p433_p6 = scmp.lt.s32.totalorder %s205_s19, %s670_s2 }
  0xf5   : > { %p434_p4 = scmp.lt.s32.totalorder %s432_s3, %s428_s26 }
  0xf6   : > { %p430_p5 = pnand %p429_p12, %p687_p11 }
  0xf7   : > { %p435_p8 = por %p434_p4, %p433_p6 }
  0xf8   : > { %p431_p7 = pneg %p430_p5 }
  0xfa   : > { %p436_p9 = pnand %p435_p8, %p431_p7 }
  0xfc   : > { %439 = shalt.err (!%p436_p9)
}
  0xfd   : > { %307 = dma.vmem_to_hbm [thread:$0]  (%p687_p11), %s208_s7, 128, %s205_s19, %s194_s22  }
  0xfe PF: > { %s219_s6 = sand.u32 1, %s470_s9   ;;  %p688_p13 = scmp.ne.s32.totalorder %s676_s16, 0 }
  0xff   : > { %p689_p10 = scmp.ge.s32.totalorder %s482_s12, 2  ;;  %s220_s8 = scalar_lea.sflag [#allocation4], %s219_s6 }
 0x101   : > { %p318_p1 = pnand %p689_p10, %p688_p13 }
 0x103   : > { %p319_p2 = pneg %p318_p1 }
 0x105   : > { %465 = dma.done.wait (%p319_p2), %s220_s8, 128  }
 0x106   : > { %467 = vsyncadd (%p319_p2), %s220_s8, 4294967168  ;;  %p16_p0 = scmp.ge.s32.totalorder %s550_s20, 4   ;;  %s690_s9 = smov %s474_s10 }
 0x107   : > { %s691_s10 = smov %s478_s11  ;;  %s692_s11 = smov %s577_s28 }
 0x108   : > { %s693_s12 = smov %s550_s20  ;;  %18 = sbr.rel (!%p16_p0) target bundleno = 6 (0x6), region = 77 }
 0x10d   :  { %225 = vsyncpa [#allocation3], 1 }
 0x10e   :  { %227 = vsyncpa [#allocation3 + $0x1], 1 }
 0x10f   :  { %228 = vsyncpa [#allocation6], 1 }
 0x110   :  { %229 = vsyncpa [#allocation4], 1 }
 0x111   :  { %231 = vsyncpa [#allocation4 + $0x1], 1 }

</bundles_post_ra>
